<compile_context>
chip_gen: v6e
topology: v6e:2x2x1
jax: 0.10.0
libtpu: 0.0.40
codegen_flags: <defaults>
</compile_context>

<pallas_src>
import functools
import math

import jax
import jax.numpy as jnp
from jax.experimental import pallas as pl
from jax.experimental.pallas import tpu as pltpu


# ----------------------------------------------------------------------------
# Fused Pallas kernel: score MLP + top-K selection + gather (b_blk graphs/step)
# ----------------------------------------------------------------------------
def _sag_pool_kernel(h_ref, w1_ref, b1_ref, w2_ref, o_ref, *, K):
    """Fused SelfAttentionGraphPooling for a block of graphs.

    Shapes seen by the kernel:
      h_ref : (Bblk, N, F)    w1_ref: (F, Hp)    b1_ref: (1, Hp)
      w2_ref: (1, Hp)         o_ref : (Bblk, K, F)
    Hp is the hidden dim zero-padded to a multiple of 128 (lane-dense).
    """
    Bblk, N, F = h_ref.shape
    h = h_ref[...]                                           # native dtype

    # --- fc1 on the whole slab (one MXU pass), tanh in f32 (v5e-safe) -------
    h2 = h.reshape(Bblk * N, F)
    t = jnp.tanh(
        jnp.dot(h2, w1_ref[...], preferred_element_type=jnp.float32)
        + b1_ref[...])                                       # (Bblk*N, Hp) f32

    # --- fc2 as VPU multiply + lane reduction (no 1-lane-wide MXU matmul) ---
    t3 = t.reshape(Bblk, N, -1)                              # (Bblk, N, Hp)
    s = jnp.sum(t3 * w2_ref[...], axis=-1)                   # (Bblk, N) f32
    # (b2 omitted: a constant offset never changes the top-K selection.)

    # --- top-K via stable descending-sort rank (single parallel pass) -------
    # rank[b, i] = #{j : s[b,j] > s[b,i]} + #{j < i : s[b,j] == s[b,i]}
    s_i = s[:, :, None]                                      # (Bblk, N, 1)
    s_j = s[:, None, :]                                      # (Bblk, 1, N)
    i_idx = jax.lax.broadcasted_iota(jnp.int32, (1, N, N), 1)
    j_idx = jax.lax.broadcasted_iota(jnp.int32, (1, N, N), 2)
    before = jnp.logical_or(s_j > s_i,
                            jnp.logical_and(s_j == s_i, j_idx < i_idx))
    rank = jnp.sum(before.astype(jnp.int32), axis=-1)        # (Bblk, N)

    # Selection matrix A[b, k, n] = (rank[b, n] == k)   -> (Bblk, K, N)
    k_idx = jax.lax.broadcasted_iota(jnp.int32, (1, K, N), 1)
    A = (rank[:, None, :] == k_idx).astype(h.dtype)

    # --- gather: out[b] = A[b] @ h[b]  (canonical batched MXU contraction) --
    out = jax.lax.dot_general(
        A, h,
        dimension_numbers=(((2,), (1,)), ((0,), (0,))),
        preferred_element_type=jnp.float32)                  # (Bblk, K, F)
    o_ref[...] = out.astype(o_ref.dtype)


# ----------------------------------------------------------------------------
# Batch-block sizing: amortize step overhead, keep grid >= 2 for v7x dual-TC,
# and cap the per-step h block against a conservative VMEM budget (v7x has
# 64 MiB physical VMEM, v5e a 16 MiB default scoped limit).
# ----------------------------------------------------------------------------
def _default_batch_block(B, N, F, dtype):
    bytes_per_graph = N * F * jnp.dtype(dtype).itemsize
    budget = 4 << 20                                 # ~4 MiB double-buffered h
    cap = max(1, budget // max(1, 2 * bytes_per_graph))
    target = B if B < 2 else max(1, B // 2)          # grid length >= 2 (v7x)
    b_blk = max(1, min(target, cap))
    while B % b_blk:
        b_blk -= 1
    return b_blk


# ----------------------------------------------------------------------------
# Wrapper: one pallas_call, grid over batch blocks ("parallel")
# ----------------------------------------------------------------------------
def sag_pool_forward(h, packed, *, ratio, b_blk=None):
    B, N, F = h.shape
    K = max(1, math.ceil(ratio * N))
    Hp = packed["w1"].shape[1]
    if b_blk is None:
        b_blk = _default_batch_block(B, N, F, h.dtype)
    assert B % b_blk == 0
    grid = (B // b_blk,)
    return pl.pallas_call(
        functools.partial(_sag_pool_kernel, K=K),
        out_shape=jax.ShapeDtypeStruct((B, K, F), h.dtype),
        grid=grid,
        in_specs=[
            pl.BlockSpec((b_blk, N, F), lambda b: (b, 0, 0)),  # h (native dtype)
            pl.BlockSpec((F, Hp), lambda b: (0, 0)),           # fc1 weight (padded)
            pl.BlockSpec((1, Hp), lambda b: (0, 0)),           # fc1 bias   (padded)
            pl.BlockSpec((1, Hp), lambda b: (0, 0)),           # fc2 weight as a row
        ],
        out_specs=pl.BlockSpec((b_blk, K, F), lambda b: (b, 0, 0)),
        compiler_params=pltpu.CompilerParams(
            dimension_semantics=("parallel",)),
    )(h, packed["w1"], packed["b1"], packed["w2"])


# ----------------------------------------------------------------------------
# Parameters (PyTorch nn.Linear default init) + lane-dense packing
# ----------------------------------------------------------------------------
def init_sag_params(key, in_f, hidden=None):
    hidden = hidden or in_f
    k1, k2, k3, k4 = jax.random.split(key, 4)
    b1_bnd = 1.0 / math.sqrt(in_f)
    b2_bnd = 1.0 / math.sqrt(hidden)
    return dict(
        w1=jax.random.uniform(k1, (in_f, hidden), jnp.float32, -b1_bnd, b1_bnd),
        b1=jax.random.uniform(k2, (hidden,), jnp.float32, -b1_bnd, b1_bnd),
        w2=jax.random.uniform(k3, (hidden, 1), jnp.float32, -b2_bnd, b2_bnd),
        b2=jax.random.uniform(k4, (1,), jnp.float32, -b2_bnd, b2_bnd),
    )


def pack_sag_params(p):
    """Zero-pad hidden dim to a multiple of 128 lanes; w2 packed as a (1, Hp) row.

    b2 is intentionally not packed: a constant added to every node's score
    cannot change the top-K selection and the scores are never output.
    """
    in_f, hidden = p["w1"].shape
    Hp = max(128, ((hidden + 127) // 128) * 128)
    w1 = jnp.zeros((in_f, Hp), jnp.float32).at[:, :hidden].set(p["w1"])
    b1 = jnp.zeros((1, Hp), jnp.float32).at[:, :hidden].set(p["b1"])
    w2 = jnp.zeros((1, Hp), jnp.float32).at[0, :hidden].set(p["w2"][:, 0])
    return dict(w1=w1, b1=b1, w2=w2)


# ----------------------------------------------------------------------------
# Pure-JAX reference (mirrors the PyTorch forward exactly, incl. b2)
# ----------------------------------------------------------------------------
def sag_pool_reference(h, p, ratio):
    B, N, _ = h.shape
    scores = (jnp.tanh(h @ p["w1"] + p["b1"]) @ p["w2"] + p["b2"])[..., 0]
    K = max(1, math.ceil(ratio * N))
    _, idx = jax.lax.top_k(scores, K)                 # descending, stable ties
    return jnp.take_along_axis(h, idx[..., None], axis=1)


# ----------------------------------------------------------------------------
if __name__ == "__main__":
    key = jax.random.PRNGKey(0)
    kh, kh2, kp = jax.random.split(key, 3)

    N, in_f, ratio = 8, 32, 0.5
    K = max(1, math.ceil(ratio * N))
    raw = init_sag_params(kp, in_f, hidden=32)
    packed = pack_sag_params(raw)
    fwd = jax.jit(functools.partial(sag_pool_forward, ratio=ratio))

    # Case 1: B=2 -> b_blk=1, grid=(2,)  (keeps both v7x TensorCores busy).
    h = jax.random.normal(kh, (2, N, in_f), jnp.float32)
    out = jax.block_until_ready(fwd(h, packed))
    assert out.shape == (2, K, in_f)
    assert bool(jnp.all(jnp.isfinite(out)))
    ref = sag_pool_reference(h, raw, ratio)
    assert bool(jnp.allclose(out, ref, atol=1e-5, rtol=1e-5)), (
        float(jnp.max(jnp.abs(out - ref))))

    # Case 2: B=4 -> b_blk=2, grid=(2,)  (exercises the batched-slab fc1 path).
    h4 = jax.random.normal(kh2, (4, N, in_f), jnp.float32)
    out4 = jax.block_until_ready(fwd(h4, packed))
    ref4 = sag_pool_reference(h4, raw, ratio)
    assert out4.shape == (4, K, in_f)
    assert bool(jnp.allclose(out4, ref4, atol=1e-5, rtol=1e-5)), (
        float(jnp.max(jnp.abs(out4 - ref4))))

    print("KERNEL_OK")
</pallas_src>

<mosaic_0001>
module attributes {stable_mosaic.version = 11 : i64} {
  func.func @_sag_pool_kernel(%arg0: i32, %arg1: memref<1x8x32xf32, #tpu.memory_space<vmem>>, %arg2: memref<32x128xf32, #tpu.memory_space<vmem>>, %arg3: memref<1x128xf32, #tpu.memory_space<vmem>>, %arg4: memref<1x128xf32, #tpu.memory_space<vmem>>, %arg5: memref<1x4x32xf32, #tpu.memory_space<vmem>>) attributes {dimension_semantics = [#tpu.dimension_semantics<parallel>], iteration_bounds = array<i64: 2>, scalar_prefetch = 0 : i64, scratch_operands = 0 : i64, tpu.core_type = #tpu.core_type<tc>, window_params = [{transform_indices = @transform_0, window_bounds = array<i64: 1, 8, 32>}, {pipeline_mode = #tpu.pipeline_mode<synchronous>, transform_indices = @transform_1, window_bounds = array<i64: 32, 128>}, {pipeline_mode = #tpu.pipeline_mode<synchronous>, transform_indices = @transform_2, window_bounds = array<i64: 1, 128>}, {pipeline_mode = #tpu.pipeline_mode<synchronous>, transform_indices = @transform_3, window_bounds = array<i64: 1, 128>}, {transform_indices = @transform_4, window_bounds = array<i64: 1, 4, 32>}]} {
    %c0 = arith.constant 0 : index
    %c0_0 = arith.constant 0 : index
    %c0_1 = arith.constant 0 : index
    %0 = vector.load %arg1[%c0, %c0_0, %c0_1] : memref<1x8x32xf32, #tpu.memory_space<vmem>>, vector<1x8x32xf32>
    %1 = vector.shape_cast %0 : vector<1x8x32xf32> to vector<8x32xf32>
    %c0_2 = arith.constant 0 : index
    %c0_3 = arith.constant 0 : index
    %2 = vector.load %arg2[%c0_2, %c0_3] : memref<32x128xf32, #tpu.memory_space<vmem>>, vector<32x128xf32>
    %cst = arith.constant dense<0.000000e+00> : vector<8x128xf32>
    %3 = tpu.matmul %1, %2, %cst {dimension_numbers = #tpu.dot_dimension_numbers<[1], [0], [0], [1], [0, 0, 1, 1], [], []>} : vector<8x32xf32>, vector<32x128xf32>, vector<8x128xf32> -> vector<8x128xf32>
    %c0_4 = arith.constant 0 : index
    %c0_5 = arith.constant 0 : index
    %4 = vector.load %arg3[%c0_4, %c0_5] : memref<1x128xf32, #tpu.memory_space<vmem>>, vector<1x128xf32>
    %5 = vector.broadcast %4 : vector<1x128xf32> to vector<8x128xf32>
    %6 = arith.addf %3, %5 : vector<8x128xf32>
    %7 = math.tanh %6 : vector<8x128xf32>
    %8 = vector.shape_cast %7 : vector<8x128xf32> to vector<1x8x128xf32>
    %c0_6 = arith.constant 0 : index
    %c0_7 = arith.constant 0 : index
    %9 = vector.load %arg4[%c0_6, %c0_7] : memref<1x128xf32, #tpu.memory_space<vmem>>, vector<1x128xf32>
    %10 = vector.shape_cast %9 : vector<1x128xf32> to vector<1x1x128xf32>
    %11 = vector.broadcast %10 : vector<1x1x128xf32> to vector<1x8x128xf32>
    %12 = arith.mulf %8, %11 : vector<1x8x128xf32>
    %cst_8 = arith.constant dense<0.000000e+00> : vector<1x8xf32>
    %13 = vector.multi_reduction <add>, %12, %cst_8 [2] : vector<1x8x128xf32> to vector<1x8xf32>
    %14 = vector.shape_cast %13 : vector<1x8xf32> to vector<1x8x1xf32>
    %15 = vector.shape_cast %13 : vector<1x8xf32> to vector<1x1x8xf32>
    %16 = tpu.iota {dimensions = array<i32: 1>} : vector<1x8x8xi32>
    %17 = tpu.iota {dimensions = array<i32: 2>} : vector<1x8x8xi32>
    %18 = vector.broadcast %15 : vector<1x1x8xf32> to vector<1x8x8xf32>
    %19 = vector.broadcast %14 : vector<1x8x1xf32> to vector<1x8x8xf32>
    %20 = arith.cmpf ogt, %18, %19 : vector<1x8x8xf32>
    %21 = vector.broadcast %15 : vector<1x1x8xf32> to vector<1x8x8xf32>
    %22 = vector.broadcast %14 : vector<1x8x1xf32> to vector<1x8x8xf32>
    %23 = arith.cmpf oeq, %21, %22 : vector<1x8x8xf32>
    %24 = arith.cmpi slt, %17, %16 : vector<1x8x8xi32>
    %25 = arith.andi %23, %24 : vector<1x8x8xi1>
    %26 = arith.ori %20, %25 : vector<1x8x8xi1>
    %27 = arith.extui %26 : vector<1x8x8xi1> to vector<1x8x8xi32>
    %cst_9 = arith.constant dense<0> : vector<1x8xi32>
    %28 = vector.multi_reduction <add>, %27, %cst_9 [2] : vector<1x8x8xi32> to vector<1x8xi32>
    %29 = tpu.iota {dimensions = array<i32: 1>} : vector<1x4x8xi32>
    %30 = vector.shape_cast %28 : vector<1x8xi32> to vector<1x1x8xi32>
    %31 = vector.broadcast %30 : vector<1x1x8xi32> to vector<1x4x8xi32>
    %32 = arith.cmpi eq, %31, %29 : vector<1x4x8xi32>
    %33 = arith.extui %32 : vector<1x4x8xi1> to vector<1x4x8xi32>
    %34 = arith.sitofp %33 : vector<1x4x8xi32> to vector<1x4x8xf32>
    %cst_10 = arith.constant dense<0.000000e+00> : vector<1x4x32xf32>
    %35 = tpu.matmul %34, %0, %cst_10 {dimension_numbers = #tpu.dot_dimension_numbers<[2], [1], [1], [2], [0, 0, 0, 1, 1, 2], [0], [0]>} : vector<1x4x8xf32>, vector<1x8x32xf32>, vector<1x4x32xf32> -> vector<1x4x32xf32>
    %c0_11 = arith.constant 0 : index
    %c0_12 = arith.constant 0 : index
    %c0_13 = arith.constant 0 : index
    %36 = vector.load %arg5[%c0_11, %c0_12, %c0_13] : memref<1x4x32xf32, #tpu.memory_space<vmem>>, vector<1x4x32xf32>
    tpu.vector_store %arg5[%c0_11, %c0_12, %c0_13], %35 {strides = array<i32>} : memref<1x4x32xf32, #tpu.memory_space<vmem>>, vector<1x4x32xf32>,
    return
  }
  func.func @transform_0(%arg0: i32) -> (i32, i32, i32) {
    %c0_i32 = arith.constant 0 : i32
    %c0_i32_0 = arith.constant 0 : i32
    %c0_i32_1 = arith.constant 0 : i32
    return %arg0, %c0_i32, %c0_i32_0 : i32, i32, i32
  }
  func.func @transform_1(%arg0: i32) -> (i32, i32) {
    %c0_i32 = arith.constant 0 : i32
    %c0_i32_0 = arith.constant 0 : i32
    %c0_i32_1 = arith.constant 0 : i32
    return %c0_i32, %c0_i32_0 : i32, i32
  }
  func.func @transform_2(%arg0: i32) -> (i32, i32) {
    %c0_i32 = arith.constant 0 : i32
    %c0_i32_0 = arith.constant 0 : i32
    %c0_i32_1 = arith.constant 0 : i32
    return %c0_i32, %c0_i32_0 : i32, i32
  }
  func.func @transform_3(%arg0: i32) -> (i32, i32) {
    %c0_i32 = arith.constant 0 : i32
    %c0_i32_0 = arith.constant 0 : i32
    %c0_i32_1 = arith.constant 0 : i32
    return %c0_i32, %c0_i32_0 : i32, i32
  }
  func.func @transform_4(%arg0: i32) -> (i32, i32, i32) {
    %c0_i32 = arith.constant 0 : i32
    %c0_i32_0 = arith.constant 0 : i32
    %c0_i32_1 = arith.constant 0 : i32
    return %arg0, %c0_i32, %c0_i32_0 : i32, i32, i32
  }
}

</mosaic_0001>

<bundles_post_ra>
// kernel: sag_pool_forward.1
= control target key start
LH: loop header
LB: loop body
LE: loop exit
PB: predicated region body
PF: predicated region fallthrough
CT: control target
= control target key end

     0   :  { %9 = vsyncpa [#allocation3], 0  ;;  %s1342_s0 = inlined_call_operand.hbm [shape: f32[2,8,32], index: 0, kind: input, shape index: {}]   ;;  %s1343_s1 = inlined_call_operand.hbm [shape: f32[32,128], index: 1, kind: input, shape index: {}]   ;;  %s1344_s2 = inlined_call_operand.vmem [shape: f32[1,128], index: 2, kind: input, shape index: {}]   ;;  %s1345_s3 = inlined_call_operand.vmem [shape: f32[1,128], index: 3, kind: input, shape index: {}]   ;;  %s1346_s4 = inlined_call_operand.hbm [shape: f32[2,4,32], index: 4, kind: output, shape index: {}]  }
   0x1   :  { %11 = vsyncpa [#allocation3 + $0x1], 0 }
   0x2   :  { %12 = vsyncpa [#allocation6], 0 }
   0x3   :  { %13 = vsyncpa [#allocation4], 0 }
   0x4   :  { %15 = vsyncpa [#allocation4 + $0x1], 0  ;;  %s1069_s15 = smov 0   ;;  %s1071_s16 = smov 0  }
   0x5   :  { %s1073_s17 = smov 0   ;;  %s1075_s18 = smov 0  }
   0x6 LB: > { %s1090_s19 = sadd.s32 4294967295, %s1034_s18   ;;  %s791_s20 = sadd.s32 4294967294, %s1034_s18   ;;  %s1034_s18 = sphi %s1075_s18, %s1374_s18   ;;  %s1030_s17 = sphi %s1073_s17, %s1373_s17   ;;  %s1026_s16 = sphi %s1071_s16, %s1372_s16   ;;  %s1022_s15 = sphi %s1069_s15, %s1371_s15  }
   0x7   : > { %p41_p0 = scmp.ne.s32.totalorder %s1026_s16, %s1022_s15  ;;  %p1347_p1 = scmp.eq.s32.totalorder %s1090_s19, 0 }
   0x8   : > { %p134_p3 = scmp.eq.s32.totalorder %s791_s20, 1  ;;  %p792_p5 = scmp.ge.s32.totalorder %s1034_s18, 1 }
   0x9   : > { %p1099_p4 = por %p1347_p1, %p41_p0  ;;  %p141_p7 = scmp.lt.s32.totalorder %s1034_s18, 3 }
   0xa   : > { %p1104_p6 = por %p134_p3, %p41_p0  ;;  %s1036_s24 = smov [#allocation5]  }
   0xb   : > { %s1351_s21 = scalar_select %p1099_p4, 1, 0 }
   0xc   : > { %s1352_s22 = scalar_select %p1104_p6, 1, 0 }
   0xd   : > { %p1109_p8 = pnand %p792_p5, %p141_p7  ;;  %s153_s25 = sshll.u32 %s1036_s24, 4  ;;  %s154_s25 = int_to_ptr.vmem [resolvable:$true] %s153_s25 }
   0xe   : > { %s1123_s27 = sadd.s32 1, %s1034_s18   ;;  %s28_s28 = sadd.s32 1, %s1030_s17 }
   0xf   : > { %s1353_s23 = scalar_select %p1109_p8, 1, 0 }
  0x10   : > { %p844_p9 = pneg %p1109_p8  ;;  %s25_s29 = ssub.s32 %s1034_s18, %s1123_s27 }
  0x11   : > { %s923_s30 = scalar_lea.vmem %s154_s25, 512  ;;  %p931_p5 = scmp.lt.s32.totalorder %s154_s25, %s154_s25 }
  0x12   : > { %p1118_p11 = pnand %p844_p9, %p1347_p1  ;;  %p924_p13 = scmp.ne.s32.totalorder %s154_s25, %s923_s30 }
  0x13   : > { %p932_p7 = scmp.lt.s32.totalorder %s923_s30, %s923_s30 }
  0x14   : > { %p914_p12 = pneg %p1118_p11 }
  0x15   : > { %p933_p10 = por %p932_p7, %p931_p5 }
  0x16   : > { %p926_p0 = pnand %p924_p13, %p914_p12 }
  0x18   : > { %p927_p3 = pneg %p926_p0 }
  0x1a   : > { %p934_p2 = pnand %p933_p10, %p927_p3 }
  0x1c   : > { %937 = shalt.err (!%p934_p2)
}
  0x1d   : > { %s1037_s5 = smov 128   ;;  %s1038_s6 = smov 8  }
  0x1e   : > { %847 = dma.hbm_to_vmem [thread:$0]  (!%p1118_p11), %s1343_s1, 512, %s154_s25, [#allocation6], %s1037_s5, %s1037_s5, %s1038_s6  }
  0x1f   : > { %p26_p9 = scmp.eq.s32.totalorder %s25_s29, 0  ;;  %p35_p12 = scmp.ne.s32.totalorder %s1030_s17, %s1026_s16 }
  0x20   : > { %p36_p10 = scmp.eq.s32.totalorder %s1034_s18, 0  ;;  %p857_p2 = scmp.lt.s32.totalorder %s1034_s18, 2 }
  0x21   : > { %s1140_s9 = scalar_select %p26_p9, %s1030_s17, %s28_s28  }
  0x22   : > { %p37_p13 = por %p36_p10, %p35_p12  ;;  %p1355_p0 = scmp.eq.s32.totalorder %s1090_s19, 1 }
  0x23   : > { %s173_s11 = sand.u32 1, %s1030_s17   ;;  %s796_s12 = sshll.u32 %s1034_s18, 7 }
  0x24   : > { %p1144_p3 = por %p1355_p0, %p35_p12  ;;  %s795_s13 = sshll.u32 %s173_s11, 3 }
  0x25   : > { %s1153_s24 = scalar_lea.hbm %s1342_s0, %s796_s12  ;;  %s177_s25 = scalar_lea.vmem [#allocation2], %s795_s13 }
  0x26   : > { %s1356_s10 = scalar_select %p1144_p3, 1, 0 }
  0x27   : > { %s184_s26 = sshll.u32 %s177_s25, 4  ;;  %p1155_p11 = pnand %p857_p2, %p37_p13  ;;  %s185_s26 = int_to_ptr.vmem [resolvable:$true] %s184_s26 }
  0x28   : > { %s174_s29 = scalar_lea.sflag [#allocation3], %s173_s11  ;;  %s938_s30 = scalar_lea.hbm %s1153_s24, 128 }
  0x29   : > { %p939_p5 = scmp.ne.s32.totalorder %s1153_s24, %s938_s30  ;;  %p940_p7 = pneg %p1155_p11 }
  0x2a   : > { %s943_s7 = scalar_lea.hbm %s1342_s0, 256  ;;  %p944_p10 = scmp.lt.s32.totalorder %s1153_s24, %s1342_s0 }
  0x2b   : > { %p941_p9 = pnand %p940_p7, %p939_p5  ;;  %p945_p2 = scmp.lt.s32.totalorder %s943_s7, %s938_s30 }
  0x2d   : > { %p942_p12 = pneg %p941_p9  ;;  %p946_p13 = por %p945_p2, %p944_p10 }
  0x2f   : > { %p947_p0 = pnand %p946_p13, %p942_p12 }
  0x31   : > { %950 = shalt.err (!%p947_p0)
}
  0x32   : > { %s951_s13 = scalar_lea.vmem %s185_s26, 128  ;;  %s1039_s11 = smov [#allocation2]  }
  0x33   : > { %p952_p1 = scmp.ne.s32.totalorder %s185_s26, %s951_s13  ;;  %s956_s14 = sshll.u32 %s1039_s11, 4  ;;  %s957_s14 = int_to_ptr.vmem [resolvable:$false] %s956_s14 }
  0x34   : > { %s958_s20 = scalar_lea.vmem %s957_s14, 256  ;;  %p959_p5 = scmp.lt.s32.totalorder %s185_s26, %s957_s14 }
  0x35   : > { %p954_p6 = pnand %p952_p1, %p940_p7  ;;  %p960_p9 = scmp.lt.s32.totalorder %s958_s20, %s951_s13 }
  0x37   : > { %p955_p3 = pneg %p954_p6  ;;  %p961_p4 = por %p960_p9, %p959_p5 }
  0x39   : > { %p962_p8 = pnand %p961_p4, %p955_p3 }
  0x3b   : > { %965 = shalt.err (!%p962_p8)
}
  0x3c   : > { %851 = dma.hbm_to_vmem [thread:$0]  (!%p1155_p11), %s1153_s24, 128, %s185_s26, %s174_s29  }
  0x3d   : > { %p1358_p12 = scmp.ne.s32.totalorder %s1353_s23, 0 }
  0x3e   : > { %s1176_s25 = sand.u32 (!%p1358_p12), 1, %s1026_s16   ;;  %p1359_p1 = scmp.ne.s32.totalorder (!%p1358_p12), %s1351_s21, 0 }
  0x3f   : > { %193 = sbr.rel (%p1358_p12) target bundleno = 1071 (0x42f), region = 36  ;;  %s798_s30 = sshll.u32 (!%p1358_p12), %s1176_s25, 3 }
  0x40   : > { %s196_s5 = scalar_lea.sflag (!%p1358_p12), [#allocation3], %s1176_s25  ;;  %s199_s6 = scalar_lea.vmem (!%p1358_p12), [#allocation2], %s798_s30 }
  0x44   : > { %1009 = dma.done.wait (%p1359_p1), %s196_s5, 128  }
  0x45   : > { %1011 = vsyncadd (%p1359_p1), %s196_s5, 4294967168  ;;  %p1360_p4 = scmp.eq.s32.totalorder %s1090_s19, 0 }
  0x47   : > { %1013 = dma.done.wait (%p1360_p4), [#allocation6], 512   ;;  %p1361_p6 = pmov %p1360_p4 }
  0x48   : > { %v1040_v0 = vmov 0.0   ;;  %vm1041_vm0 = vmmov 0   ;;  %v232_v1 = vld [vmem:[#allocation5 + $0x18] sm:$0xff]  ;;  %v231_v2 = vld [vmem:[#allocation5 + $0x10] sm:$0xff]  ;;  %v230_v4 = vld [vmem:[#allocation5 + $0x8] sm:$0xff]  ;;  %vm240_vm1 = vcmask 261120   ;;  %v325_v6 = vlaneseq }
  0x49   : > { %1015 = vsyncadd (%p1361_p6), [#allocation6], 4294966784  ;;  %820 = vmatprep.subr.mxu0 %v1040_v0  ;;  %828 = vmatprep.mubr.msk.f32.mxu0 %vm1041_vm0, %v1040_v0  ;;  %v228_v3 = vld [vmem:[%s199_s6] sm:$0xff]  ;;  %v229_v5 = vld [vmem:[#allocation5] sm:$0xff]  ;;  %v1042_v10 = vmov 0   ;;  %v1362_v47 = vmov 0 }
  0x4a   : > { %831 = vmatprep.subr.mxu1 %v1040_v0  ;;  %833 = vmatprep.mubr.msk.f32.mxu1 %vm1041_vm0, %v1040_v0  ;;  %v1195_v7 = vshrl.u32 %v325_v6, 7  ;;  %v1197_v8 = vand.u32 127, %v325_v6  ;;  %v801_v25 = vld [vmem:[%s1344_s2] ss:$0 sm:$0xff]  ;;  %v1365_v53 = vmov 0  ;;  %s800_s28 = sshll.u32 %s1176_s25, 2 }
  0x4b   : > { %821 = vmatpush3.msra.mxu0 %v232_v1  ;;  %832 = vmatpush3.msra.mxu1 %v228_v3  ;;  %v803_v29 = vld [vmem:[%s1345_s3] ss:$0 sm:$0xff]  ;;  %s810_s29 = sshll.u32 %s1090_s19, 6  ;;  %s227_s7 = scalar_lea.vmem [#allocation7], %s800_s28 }
  0x4c   : > { %822 = vmatprep.subr.mxu0 %v1040_v0  ;;  %v1200_v9 = vsub.s32 1, %v1195_v7  ;;  %vm386_vm2 = vcmp.lt.s32.totalorder %v1197_v8, %v1195_v7  ;;  %899 = vset.pattern.permute.xlu1 %v1042_v10  ;;  %v1209_v13 = vsub.s32 2, %v1195_v7  ;;  %v1212_v14 = vsub.s32 3, %v1195_v7  ;;  %s711_s8 = sshll.u32 %s227_s7, 4  ;;  %s1299_s11 = scalar_lea.hbm %s1346_s4, %s810_s29  ;;  %s1301_s8 = int_to_ptr.vmem [resolvable:$true] %s711_s8 }
  0x4d   : > { %823 = vmatpush3.msra.mxu0 %v231_v2  ;;  %v387_v11 = vsel %vm386_vm2, 1, %v1042_v10  ;;  %898 = vset.pattern.permute.xlu0 %v1042_v10  ;;  %v348_v17 = vsub.s32 4, %v1195_v7  ;;  %v352_v19 = vsub.s32 5, %v1195_v7  ;;  %v356_v21 = vsub.s32 6, %v1195_v7  ;;  %s698_s14 = scalar_lea.sflag [#allocation4], %s1176_s25  ;;  %s966_s20 = scalar_lea.vmem %s1301_s8, 64 }
  0x4e   : > { %824 = vmatprep.subr.mxu0 %v1040_v0  ;;  %v398_v12 = vrot.slane %v387_v11, %v1200_v9  ;;  %v405_v15 = vrot.slane %v387_v11, %v1209_v13  ;;  %v412_v16 = vrot.slane %v387_v11, %v1212_v14  ;;  %v360_v23 = vsub.s32 7, %v1195_v7  ;;  %p967_p8 = scmp.ne.s32.totalorder %s1301_s8, %s966_s20  ;;  %p1368_p3 = scmp.ne.s32.totalorder %s1356_s10, 0 }
  0x4f   : > { %825 = vmatpush3.msra.mxu0 %v230_v4  ;;  %v419_v18 = vrot.slane %v387_v11, %v348_v17  ;;  %v426_v20 = vrot.slane %v387_v11, %v352_v19  ;;  %v433_v22 = vrot.slane %v387_v11, %v356_v21  ;;  %v1229_v32 = vsub.s32 0, %v1195_v7  ;;  %s1043_s19 = smov [#allocation7]  }
  0x50   : > { %826 = vmatprep.subr.mxu0 %v1040_v0  ;;  %400 = vbcast.lane.b32.xlu1 %v398_v12, 256  ;;  %v440_v24 = vrot.slane %v387_v11, %v360_v23  ;;  %v1260_v61 = vsub.s32 %v1197_v8, %v1195_v7  ;;  %p968_p11 = pnand %p967_p8, %p1368_p3  ;;  %s970_s30 = sshll.u32 %s1043_s19, 4  ;;  %s971_s30 = int_to_ptr.vmem [resolvable:$false] %s970_s30 }
  0x51   : > { %827 = vmatpush3.msra.mxu0 %v229_v5  ;;  %v391_v33 = vrot.slane %v387_v11, %v1229_v32  ;;  %s972_s5 = scalar_lea.vmem %s971_s30, 128  ;;  %p973_p10 = scmp.lt.s32.totalorder %s1301_s8, %s971_s30 }
  0x52   : > { %829 = vmatmul.mubr.msk.f32.vlgmr.msra.gmra.mxu0 %vm240_vm1, %v228_v3  ;;  %p969_p7 = pneg %p968_p11  ;;  %p974_p2 = scmp.lt.s32.totalorder %s972_s5, %s966_s20 }
  0x54   : > { %407 = vbcast.lane.b32.xlu1 %v405_v15, 256  ;;  %p975_p13 = por %p974_p2, %p973_p10 }
  0x56   : > { %p976_p0 = pnand %p975_p13, %p969_p7 }
  0x58   : > { %414 = vbcast.lane.b32.xlu1 %v412_v16, 256 }
  0x5c   : > { %421 = vbcast.lane.b32.xlu1 %v419_v18, 256 }
  0x60   : > { %428 = vbcast.lane.b32.xlu1 %v426_v20, 256 }
  0x64   : > { %435 = vbcast.lane.b32.xlu1 %v433_v22, 256 }
  0x68   : > { %442 = vbcast.lane.b32.xlu1 %v440_v24, 256 }
  0xc2   : > { %v401_v34 = vpop.permute.xlu1 %400 }
  0xc3   : > { %vm445_vm12 = vcmp.ne.s32.totalorder %v401_v34, 0 }
  0xc6   : > { %v408_v35 = vpop.permute.xlu1 %407 }
  0xc7   : > { %vm446_vm2 = vcmp.ne.s32.totalorder %v408_v35, 0  ;;  %v571_v35 = vrot.slane %v1195_v7, %v1209_v13 }
  0xca   : > { %v415_v36 = vpop.permute.xlu1 %414 }
  0xce   : > { %v422_v37 = vpop.permute.xlu1 %421 }
  0xd2   : > { %v429_v38 = vpop.permute.xlu1 %428 }
  0xd6   : > { %v436_v39 = vpop.permute.xlu1 %435 }
  0xda   : > { %v443_v40 = vpop.permute.xlu1 %442 }
  0xdb   : > { %vm451_vm3 = vcmp.ne.s32.totalorder %v443_v40, 0  ;;  %v567_v40 = vrot.slane %v1195_v7, %v1200_v9 }
 0x112   : > { %v310_v26 = vpop.f32.mrf.mxu0 }
 0x113   : > { %v311_v27 = vadd.f32 %v801_v25, %v310_v26 }
 0x114   : > { %v830_v28 = vpop.f32.mrf.mxu0 }
 0x115   : > { %910 = vtanh.f32 %v311_v27 }
 0x122   : > { %v911_v30 = vpop.eup %910 }
 0x123   : > { %v322_v31 = vmul.f32 %v911_v30, %v803_v29 }
 0x125   : > { %323 = vadd.xlane.f32.xlu0 %v322_v31 }
 0x13b   : > { %393 = vbcast.lane.b32.xlu0 %v391_v33, 256 }
 0x1ae   : > { %v324_v41 = vpop.xlane.xlu0 %323 }
 0x1af   : > { %v361_v42 = vrot.slane %v324_v41, %v360_v23  ;;  %v333_v43 = vrot.slane %v324_v41, %v1229_v32  ;;  %v337_v44 = vrot.slane %v324_v41, %v1200_v9  ;;  %v341_v45 = vrot.slane %v324_v41, %v1209_v13 }
 0x1b0   : > { %v345_v48 = vrot.slane %v324_v41, %v1212_v14  ;;  %v349_v49 = vrot.slane %v324_v41, %v348_v17  ;;  %v353_v51 = vrot.slane %v324_v41, %v352_v19  ;;  %v357_v54 = vrot.slane %v324_v41, %v356_v21 }
 0x1b1   : > { %vm385_vm4 = vcmp.eq.f32.partialorder %v324_v41, %v361_v42  ;;  %vm378_vm6 = vcmp.eq.f32.partialorder %v324_v41, %v333_v43  ;;  %vm379_vm8 = vcmp.eq.f32.partialorder %v324_v41, %v337_v44  ;;  %vm370_vm9 = vcmp.gt.f32.partialorder %v324_v41, %v333_v43 }
 0x1b2   : > { %v394_v46 = vpop.permute.xlu0 %393  ;;  %vm1235_vm5 = vmand %vm385_vm4, %vm451_vm3  ;;  %vm371_vm11 = vcmp.gt.f32.partialorder %v324_v41, %v337_v44  ;;  %vm380_vm14 = vcmp.eq.f32.partialorder %v324_v41, %v341_v45  ;;  %vm377_vm15 = vcmp.gt.f32.partialorder %v324_v41, %v361_v42  ;;  %vm372_vm1 = vcmp.gt.f32.partialorder %v324_v41, %v341_v45 }
 0x1b3   : > { %v1363_v47 = vsel %vm1235_vm5, 4294967295, %v1362_v47  ;;  %vm444_vm7 = vcmp.ne.s32.totalorder %v394_v46, 0  ;;  %vm453_vm0 = vmand %vm379_vm8, %vm445_vm12  ;;  %vm381_vm4 = vcmp.eq.f32.partialorder %v324_v41, %v345_v48 }
 0x1b4   : > { %vm452_vm10 = vmand %vm378_vm6, %vm444_vm7  ;;  %vm373_vm6 = vcmp.gt.f32.partialorder %v324_v41, %v345_v48  ;;  %vm447_vm7 = vcmp.ne.s32.totalorder %v415_v36, 0  ;;  %v575_v36 = vrot.slane %v1195_v7, %v1212_v14 }
 0x1b5   : > { %vm460_vm13 = vmor %vm370_vm9, %vm452_vm10  ;;  %vm448_vm9 = vcmp.ne.s32.totalorder %v422_v37, 0  ;;  %vm1364_vm10 = vnez %v1363_v47 }
 0x1b6   : > { %v468_v50 = vsel %vm460_vm13, 1, %v1042_v10  ;;  %vm461_vm3 = vmor %vm371_vm11, %vm453_vm0  ;;  %vm382_vm13 = vcmp.eq.f32.partialorder %v324_v41, %v349_v49  ;;  %vm374_vm0 = vcmp.gt.f32.partialorder %v324_v41, %v349_v49 }
 0x1b7   : > { %477 = vperm.xlu0 %898, %v468_v50   ;;  %v469_v52 = vsel %vm461_vm3, 1, %v1042_v10  ;;  %vm454_vm5 = vmand %vm380_vm14, %vm446_vm2  ;;  %vm449_vm3 = vcmp.ne.s32.totalorder %v429_v38, 0  ;;  %vm383_vm14 = vcmp.eq.f32.partialorder %v324_v41, %v353_v51 }
 0x1b8   : > { %vm1244_vm8 = vmor %vm377_vm15, %vm1364_vm10  ;;  %480 = vperm.xlu1 %899, %v469_v52   ;;  %vm375_vm15 = vcmp.gt.f32.partialorder %v324_v41, %v353_v51 }
 0x1b9   : > { %v1366_v53 = vsel %vm1244_vm8, 4294967295, %v1365_v53  ;;  %vm462_vm12 = vmor %vm372_vm1, %vm454_vm5  ;;  %vm450_vm8 = vcmp.ne.s32.totalorder %v436_v39, 0  ;;  %vm384_vm5 = vcmp.eq.f32.partialorder %v324_v41, %v357_v54  ;;  %v563_v39 = vrot.slane %v1195_v7, %v1229_v32 }
 0x1ba   : > { %vm455_vm11 = vmand %vm381_vm4, %vm447_vm7  ;;  %v470_v55 = vsel %vm462_vm12, 1, %v1042_v10  ;;  %vm376_vm7 = vcmp.gt.f32.partialorder %v324_v41, %v357_v54 }
 0x1bb   : > { %vm463_vm2 = vmor %vm373_vm6, %vm455_vm11 }
 0x1bc   : > { %v471_v56 = vsel %vm463_vm2, 1, %v1042_v10  ;;  %vm456_vm10 = vmand %vm382_vm13, %vm448_vm9  ;;  %483 = vperm.xlu1 %899, %v470_v55   ;;  %vm1367_vm9 = vnez %v1366_v53  ;;  %vm534_vm13 = vcmask 1042434   ;;  %vm540_vm2 = vcmask 1045509  }
 0x1bd   : > { %486 = vperm.xlu0 %898, %v471_v56   ;;  %vm464_vm1 = vmor %vm374_vm0, %vm456_vm10  ;;  %v475_v60 = vsel %vm1367_vm9, 1, %v1042_v10  ;;  %vm536_vm0 = vcmask 1043459   ;;  %vm544_vm10 = vcmask 1047559  }
 0x1be   : > { %vm457_vm4 = vmand %vm383_vm14, %vm449_vm3  ;;  %v472_v57 = vsel %vm464_vm1, 1, %v1042_v10  ;;  %vm538_vm3 = vcmask 1044484   ;;  %vm542_vm14 = vcmask 1046534  }
 0x1bf   : > { %vm465_vm6 = vmor %vm375_vm15, %vm457_vm4  ;;  %vm546_vm15 = vcmask 64512  }
 0x1c0   : > { %v473_v58 = vsel %vm465_vm6, 1, %v1042_v10  ;;  %vm458_vm11 = vmand %vm384_vm5, %vm450_vm8  ;;  %489 = vperm.xlu1 %899, %v472_v57   ;;  %vm532_vm8 = vcmask 1041409   ;;  %vm695_vm6 = vcmask 257024  }
 0x1c1   : > { %492 = vperm.xlu0 %898, %v473_v58   ;;  %vm466_vm12 = vmor %vm376_vm7, %vm458_vm11 }
 0x1c2   : > { %v474_v59 = vsel %vm466_vm12, 1, %v1042_v10 }
 0x1c4   : > { %495 = vperm.xlu1 %899, %v474_v59  }
 0x1c5   : > { %498 = vperm.xlu0 %898, %v475_v60  }
 0x232   : > { %v478_v62 = vpop.permute.xlu0 %477 }
 0x233   : > { %v481_v63 = vpop.permute.xlu1 %480  ;;  %v503_v1 = vrot.slane %v478_v62, %v1260_v61 }
 0x234   : > { %v507_v2 = vrot.slane %v481_v63, %v1260_v61 }
 0x236   : > { %v533_v3 = vsel %vm532_vm8, %v507_v2, %v503_v1 }
 0x237   : > { %v484_v4 = vpop.permute.xlu1 %483 }
 0x238   : > { %v487_v5 = vpop.permute.xlu0 %486  ;;  %v511_v6 = vrot.slane %v484_v4, %v1260_v61 }
 0x239   : > { %v515_v10 = vrot.slane %v487_v5, %v1260_v61 }
 0x23a   : > { %v535_v8 = vsel %vm534_vm13, %v511_v6, %v533_v3 }
 0x23b   : > { %v537_v11 = vsel %vm536_vm0, %v515_v10, %v535_v8  ;;  %v490_v12 = vpop.permute.xlu1 %489 }
 0x23c   : > { %v493_v15 = vpop.permute.xlu0 %492  ;;  %v519_v16 = vrot.slane %v490_v12, %v1260_v61 }
 0x23d   : > { %v523_v17 = vrot.slane %v493_v15, %v1260_v61 }
 0x23e   : > { %v539_v18 = vsel %vm538_vm3, %v519_v16, %v537_v11 }
 0x23f   : > { %v541_v19 = vsel %vm540_vm2, %v523_v17, %v539_v18  ;;  %v496_v20 = vpop.permute.xlu1 %495 }
 0x240   : > { %v499_v21 = vpop.permute.xlu0 %498  ;;  %v527_v22 = vrot.slane %v496_v20, %v1260_v61 }
 0x241   : > { %v531_v23 = vrot.slane %v499_v21, %v1260_v61 }
 0x242   : > { %v543_v24 = vsel %vm542_vm14, %v527_v22, %v541_v19 }
 0x243   : > { %v545_v25 = vsel %vm544_vm10, %v531_v23, %v543_v24 }
 0x244   : > { %v547_v26 = vsel %vm546_vm15, %v545_v25, 0 }
 0x245   : > { %v549_v27 = vshrl.u32 %v547_v26, 16  ;;  %v548_v28 = vand.u32 65535, %v547_v26 }
 0x247   : > { %v551_v29 = vcvt.s32.f32 %v549_v27  ;;  %v550_v30 = vcvt.s32.f32 %v548_v28 }
 0x249   : > { %554 = vadd.xlane.f32.xlu1 %v551_v29  ;;  %552 = vadd.xlane.f32.xlu0 %v550_v30 }
 0x2d2   : > { %v555_v31 = vpop.xlane.xlu1 %554  ;;  %v553_v33 = vpop.xlane.xlu0 %552 }
 0x2d3   : > { %v557_v34 = vcvt.f32.s32 %v555_v31  ;;  %v556_v38 = vcvt.f32.s32 %v553_v33 }
 0x2d5   : > { %v558_v37 = vshll.u32 %v557_v34, 16 }
 0x2d7   : > { %v559_v41 = vadd.s32 %v558_v37, %v556_v38 }
 0x2d9   : > { %vm578_vm1 = vcmp.eq.s32.totalorder %v559_v41, %v571_v35  ;;  %vm579_vm5 = vcmp.eq.s32.totalorder %v559_v41, %v575_v36  ;;  %vm576_vm4 = vcmp.eq.s32.totalorder %v559_v41, %v563_v39  ;;  %vm577_vm7 = vcmp.eq.s32.totalorder %v559_v41, %v567_v40 }
 0x2da   : > { %v806_v42 = vsel %vm578_vm1, 1.0, %v1040_v0  ;;  %v807_v13 = vsel %vm579_vm5, 1.0, %v1040_v0  ;;  %v804_v43 = vsel %vm576_vm4, 1.0, %v1040_v0  ;;  %v805_v14 = vsel %vm577_vm7, 1.0, %v1040_v0 }
 0x2db   : > { %v905_v44 = vpack.i.bf16 %v807_v13, %v806_v42  ;;  %v900_v45 = vpack.i.bf16 %v805_v14, %v804_v43 }
 0x2dd   : > { %906 = vperm.xlu1 %899, %v905_v44   ;;  %901 = vperm.xlu0 %898, %v900_v45  }
 0x358   : > { %v907_v7 = vpop.permute.xlu1 %906  ;;  %v902_v9 = vpop.permute.xlu0 %901 }
 0x359   : > { %v909_v32 = vunpack.i.h.bf16 %v907_v7  ;;  %v908_v46 = vunpack.i.l.bf16 %v907_v7  ;;  %v904_v47 = vunpack.i.h.bf16 %v902_v9  ;;  %v903_v48 = vunpack.i.l.bf16 %v902_v9 }
 0x35b   : > { %v615_v49 = vrot.slane %v908_v46, %v1260_v61  ;;  %v611_v50 = vrot.slane %v904_v47, %v1260_v61  ;;  %v607_v51 = vrot.slane %v903_v48, %v1260_v61  ;;  %v619_v0 = vrot.slane %v909_v32, %v1260_v61 }
 0x35d   : > { %v620_v52 = vsel %vm532_vm8, %v611_v50, %v607_v51 }
 0x35e   : > { %v621_v53 = vsel %vm534_vm13, %v615_v49, %v620_v52 }
 0x35f   : > { %v622_v54 = vsel %vm536_vm0, %v619_v0, %v621_v53 }
 0x360   : > { %834 = vmatmul.mubr.msk.f32.vlgmr.msra.gmra.mxu1 %vm546_vm15, %v622_v54 }
 0x420   : > { %v691_v55 = vpop.f32.mrf.mxu1 }
 0x421   : > { %696 = vst.msk [vmem:[%s227_s7] sm:$0xf] %vm695_vm6, %v691_v55 }
 0x422   : > { %v835_v56 = vpop.f32.mrf.mxu1 }
 0x423   : > { %979 = shalt.err (!%p976_p0)
}
 0x424   : > { %s980_s6 = scalar_lea.hbm %s1299_s11, 64  ;;  %s984_s23 = scalar_lea.hbm %s1346_s4, 128 }
 0x425   : > { %p981_p5 = scmp.ne.s32.totalorder %s1299_s11, %s980_s6  ;;  %p985_p1 = scmp.lt.s32.totalorder %s1299_s11, %s1346_s4 }
 0x426   : > { %p986_p4 = scmp.lt.s32.totalorder %s984_s23, %s980_s6 }
 0x427   : > { %p982_p9 = pnand %p981_p5, %p1368_p3 }
 0x428   : > { %p987_p6 = por %p986_p4, %p985_p1 }
 0x429   : > { %p983_p12 = pneg %p982_p9 }
 0x42b   : > { %p988_p8 = pnand %p987_p6, %p983_p12 }
 0x42d   : > { %991 = shalt.err (!%p988_p8)
}
 0x42e   : > { %842 = dma.vmem_to_hbm [thread:$0]  (%p1368_p3), %s1301_s8, 64, %s1299_s11, %s698_s14  }
 0x42f PF: > { %s723_s28 = sand.u32 1, %s1022_s15   ;;  %p1369_p11 = scmp.ne.s32.totalorder %s1352_s22, 0 }
 0x430   : > { %p1370_p7 = scmp.ge.s32.totalorder %s1034_s18, 2  ;;  %s724_s29 = scalar_lea.sflag [#allocation4], %s723_s28 }
 0x432   : > { %p853_p10 = pnand %p1370_p7, %p1369_p11 }
 0x434   : > { %p854_p2 = pneg %p853_p10 }
 0x436   : > { %1017 = dma.done.wait (%p854_p2), %s724_s29, 64  }
 0x437   : > { %1019 = vsyncadd (%p854_p2), %s724_s29, 4294967232  ;;  %p18_p13 = scmp.ge.s32.totalorder %s1123_s27, 4   ;;  %s1371_s15 = smov %s1026_s16 }
 0x438   : > { %s1372_s16 = smov %s1030_s17  ;;  %s1373_s17 = smov %s1140_s9 }
 0x439   : > { %s1374_s18 = smov %s1123_s27  ;;  %20 = sbr.rel (!%p18_p13) target bundleno = 6 (0x6), region = 85 }
 0x43e   :  { %729 = vsyncpa [#allocation3], 1 }
 0x43f   :  { %731 = vsyncpa [#allocation3 + $0x1], 1 }
 0x440   :  { %732 = vsyncpa [#allocation6], 1 }
 0x441   :  { %733 = vsyncpa [#allocation4], 1 }
 0x442   :  { %735 = vsyncpa [#allocation4 + $0x1], 1 }

</bundles_post_ra>
